<compile_context>
chip_gen: v7x
topology: tpu7x:2x2x1
jax: 0.10.0
libtpu: 0.0.40
codegen_flags: <defaults>
</compile_context>

<pallas_src>
import functools

import jax
import jax.numpy as jnp
from jax.experimental import pallas as pl
from jax.experimental.pallas import tpu as pltpu


# ----------------------------------------------------------------------------
# Helpers
# ----------------------------------------------------------------------------
def _round_up(x, m):
    return ((x + m - 1) // m) * m


def _pick_tile(dim, target, align):
    """Largest `align`-multiple divisor of `dim` <= target, else `dim`.

    Feature dims (E, 3E) are normally 128-multiples so the divisor search
    succeeds; the full-dim fallback only triggers for unusual model dims.
    # TODO(synk): pad F / K (like M) instead of falling back for huge odd dims.
    """
    if dim <= target:
        return dim
    t = (target // align) * align
    while t >= align:
        if dim % t == 0:
            return t
        t -= align
    return dim


@functools.lru_cache(maxsize=1)
def _vmem_limit_bytes():
    """Generation-aware scoped-VMEM limit: ~3/4 of physical, capped at 96 MiB.

    v5e / v6e (128 MiB physical) -> 96 MiB, v7x (64 MiB physical) -> 48 MiB.
    Falls back to a conservative 48 MiB if the hardware query is unavailable.
    """
    cap = None
    try:
        cap = getattr(pltpu.get_tpu_info(), "vmem_capacity_bytes", None)
    except Exception:
        cap = None
    if not cap:
        cap = 64 * 1024 * 1024
    return int(min(96 * 1024 * 1024, cap * 3 // 4))


# ----------------------------------------------------------------------------
# Tiled linear kernel:  y = x @ w + b   (w already transposed to (in, out))
# ----------------------------------------------------------------------------
def _linear_kernel(x_ref, w_ref, b_ref, o_ref, acc_ref):
    # x: (tm, tk) -> bf16, w: (tk, tn) bf16, b: (1, tn) f32, o: (tm, tn).
    @pl.when(pl.program_id(2) == 0)
    def _():
        acc_ref[...] = jnp.zeros_like(acc_ref)

    acc_ref[...] += jnp.dot(x_ref[...].astype(jnp.bfloat16), w_ref[...],
                            preferred_element_type=jnp.float32)

    @pl.when(pl.program_id(2) == pl.num_programs(2) - 1)
    def _():
        o_ref[...] = (acc_ref[...] + b_ref[...]).astype(o_ref.dtype)


def pallas_linear(x, w, b, *, out_dtype=jnp.float32, tm=512, tn=512, tk=512):
    """x: (M, K) f32/bf16, w: (K, F) bf16, b: (F,) f32 -> (M, F) out_dtype."""
    M, K = x.shape
    Kw, F = w.shape
    assert K == Kw
    tm = min(tm, _round_up(M, 16))          # 16: bf16 sublane packing
    Mp = _round_up(M, tm)                   # pad rows instead of untiling
    tn = _pick_tile(F, tn, 128)
    tk = _pick_tile(K, tk, 128)
    xp = x if Mp == M else jnp.pad(x, ((0, Mp - M), (0, 0)))
    grid = (Mp // tm, F // tn, K // tk)
    cost = pl.CostEstimate(
        flops=int(2 * Mp * K * F),
        transcendentals=0,
        bytes_accessed=int(Mp * K * xp.dtype.itemsize
                           + K * F * w.dtype.itemsize
                           + 4 * F + Mp * F * jnp.dtype(out_dtype).itemsize))
    out = pl.pallas_call(
        _linear_kernel,
        out_shape=jax.ShapeDtypeStruct((Mp, F), out_dtype),
        grid=grid,
        in_specs=[
            pl.BlockSpec((tm, tk), lambda i, j, k: (i, k)),
            pl.BlockSpec((tk, tn), lambda i, j, k: (k, j)),
            pl.BlockSpec((1, tn), lambda i, j, k: (0, j)),
        ],
        out_specs=pl.BlockSpec((tm, tn), lambda i, j, k: (i, j)),
        scratch_shapes=[pltpu.VMEM((tm, tn), jnp.float32)],
        compiler_params=pltpu.CompilerParams(
            dimension_semantics=("parallel", "parallel", "arbitrary"),
            vmem_limit_bytes=_vmem_limit_bytes()),
        cost_estimate=cost,
    )(xp, w, b.reshape(1, F))
    return out if Mp == M else out[:M]


# ----------------------------------------------------------------------------
# Fused scaled-dot-product attention + output projection.
# Grid = (batch, head); the (L, E) output block stays resident across the
# (inner, "arbitrary") head axis and accumulates each head's slice of the
# output projection -> one lane-dense E-wide HBM writeback per batch element.
# ----------------------------------------------------------------------------
def _attn_outproj_kernel(q_ref, k_ref, v_ref, wo_ref, bo_ref, o_ref, *w_refs,
                         scale, num_heads, need_weights):
    # q: (L, Dh) bf16, k/v: (S, Dh) bf16, wo: (Dh, E) bf16, bo: (1, E) f32,
    # o: (L, E) f32, optional w: (L, S) f32 (head-averaged attention weights).
    h = pl.program_id(1)

    s = jax.lax.dot_general(                           # q @ k^T without k.T
        q_ref[...], k_ref[...],
        dimension_numbers=(((1,), (1,)), ((), ())),
        preferred_element_type=jnp.float32) * scale    # (L, S) f32
    m = jnp.max(s, axis=-1, keepdims=True)
    e = jnp.exp(s - m)
    denom = jnp.sum(e, axis=-1, keepdims=True)
    p = e * pl.reciprocal(denom, approx=False)         # exact softmax rows
    ctx = jnp.dot(p.astype(jnp.bfloat16), v_ref[...],
                  preferred_element_type=jnp.float32)  # (L, Dh) f32
    # Fused out-projection: out = sum_h ctx_h @ W_out[h*Dh:(h+1)*Dh, :] + b
    contrib = jnp.dot(ctx.astype(jnp.bfloat16), wo_ref[...],
                      preferred_element_type=jnp.float32)       # (L, E) f32

    @pl.when(h == 0)
    def _():
        o_ref[...] = contrib + bo_ref[...]

    @pl.when(h != 0)
    def _():
        o_ref[...] += contrib

    if need_weights:
        w_ref = w_refs[0]
        w_part = p * (1.0 / num_heads)                 # head-average in-kernel

        @pl.when(h == 0)
        def _():
            w_ref[...] = w_part

        @pl.when(h != 0)
        def _():
            w_ref[...] += w_part


def pallas_attention(q_arr, k_arr, v_arr, comps, wo, bo, scale, *,
                     need_weights=True):
    """q_arr: (Cq, N, H, L, Dh) bf16, k_arr/v_arr: (Ck/Cv, N, H, S, Dh) bf16
    (possibly all the same array; `comps` picks the component index so the
    fused QKV projection output is consumed without XLA slices).
    wo: (H, Dh, E) bf16, bo: (1, E) f32.
    Returns attn_out (N, L, E) f32 and head-averaged weights (N, L, S) or None.
    """
    qc, kc, vc = comps
    _, N, H, L, Dh = q_arr.shape
    S = k_arr.shape[3]
    E = H * Dh

    out_shape = [jax.ShapeDtypeStruct((N, L, E), jnp.float32)]
    out_specs = [pl.BlockSpec((None, L, E), lambda n, h: (n, 0, 0))]
    if need_weights:
        out_shape.append(jax.ShapeDtypeStruct((N, L, S), jnp.float32))
        out_specs.append(pl.BlockSpec((None, L, S), lambda n, h: (n, 0, 0)))

    kernel = functools.partial(_attn_outproj_kernel, scale=scale, num_heads=H,
                               need_weights=need_weights)
    cost = pl.CostEstimate(
        flops=int(4 * N * H * L * S * Dh + 2 * N * L * E * E),
        transcendentals=int(N * H * L * S),
        bytes_accessed=int(2 * N * H * (L + 2 * S) * Dh + 2 * N * E * E
                           + 4 * N * L * E
                           + (4 * N * L * S if need_weights else 0)))
    outs = pl.pallas_call(
        kernel,
        grid=(N, H),
        out_shape=tuple(out_shape),
        in_specs=[
            pl.BlockSpec((None, None, None, L, Dh),
                         lambda n, h, c=qc: (c, n, h, 0, 0)),
            pl.BlockSpec((None, None, None, S, Dh),
                         lambda n, h, c=kc: (c, n, h, 0, 0)),
            pl.BlockSpec((None, None, None, S, Dh),
                         lambda n, h, c=vc: (c, n, h, 0, 0)),
            pl.BlockSpec((None, Dh, E), lambda n, h: (h, 0, 0)),
            pl.BlockSpec((1, E), lambda n, h: (0, 0)),
        ],
        out_specs=tuple(out_specs),
        compiler_params=pltpu.CompilerParams(
            # batch axis -> megacore; head axis is "arbitrary" because the
            # lane-dense output and averaged weights accumulate across it.
            dimension_semantics=("parallel", "arbitrary"),
            vmem_limit_bytes=_vmem_limit_bytes()),
        cost_estimate=cost,
    )(q_arr, k_arr, v_arr, wo, bo)
    return (outs[0], outs[1]) if need_weights else (outs[0], None)


# ----------------------------------------------------------------------------
# MultiheadAttention forward (wrapper / glue)
# ----------------------------------------------------------------------------
def multihead_attention(query, key, value, params, num_heads,
                        need_weights=True):
    """Equivalent of nn.MultiheadAttention.forward (eval mode, no masks,
    batch_first=False, average_attn_weights=True).

    query: (L, N, E), key/value: (S, N, E).
    Returns (attn_output (L, N, E), attn_weights (N, L, S) or None).
    """
    L, N, E = query.shape
    S = key.shape[0]
    H = num_heads
    assert E % H == 0
    Dh = E // H
    scale = 1.0 / float(Dh) ** 0.5

    # Static params: transpose to (in, out) layout and cast to bf16 once.
    in_w_t = params["in_proj_weight"].T.astype(jnp.bfloat16)      # (E, 3E)
    in_b = params["in_proj_bias"].astype(jnp.float32)             # (3E,)
    out_w_t = params["out_proj_weight"].T.astype(jnp.bfloat16)    # (E, E)
    wo3 = out_w_t.reshape(H, Dh, E)                                # free reshape
    bo = params["out_proj_bias"].astype(jnp.float32).reshape(1, E)

    def to_heads(y, length, ncomp):
        # (length*N, ncomp*E) bf16 -> (ncomp, N, H, length, Dh): one XLA
        # transpose that makes every per-head (length, Dh) slab a layout-clean
        # full-last-two-dims DMA block for the attention kernel.
        return y.reshape(length, N, ncomp, H, Dh).transpose(2, 1, 3, 0, 4)

    if query is key and key is value:
        # Self-attention: one fused (L*N, E) @ (E, 3E) projection; q/k/v
        # components are selected by the attention BlockSpec index maps.
        qkv = pallas_linear(query.reshape(L * N, E), in_w_t, in_b,
                            out_dtype=jnp.bfloat16)                # (L*N, 3E)
        qh = kh = vh = to_heads(qkv, L, 3)
        comps = (0, 1, 2)
    elif key is value:
        # Shared K/V source: stacked (S*N, E) @ (E, 2E) projection.
        q = pallas_linear(query.reshape(L * N, E), in_w_t[:, :E], in_b[:E],
                          out_dtype=jnp.bfloat16)
        kv = pallas_linear(key.reshape(S * N, E), in_w_t[:, E:], in_b[E:],
                           out_dtype=jnp.bfloat16)                 # (S*N, 2E)
        qh = to_heads(q, L, 1)
        kh = vh = to_heads(kv, S, 2)
        comps = (0, 0, 1)
    else:
        q = pallas_linear(query.reshape(L * N, E), in_w_t[:, :E], in_b[:E],
                          out_dtype=jnp.bfloat16)
        k = pallas_linear(key.reshape(S * N, E), in_w_t[:, E:2 * E],
                          in_b[E:2 * E], out_dtype=jnp.bfloat16)
        v = pallas_linear(value.reshape(S * N, E), in_w_t[:, 2 * E:],
                          in_b[2 * E:], out_dtype=jnp.bfloat16)
        qh, kh, vh = to_heads(q, L, 1), to_heads(k, S, 1), to_heads(v, S, 1)
        comps = (0, 0, 0)

    out_nle, attn = pallas_attention(qh, kh, vh, comps, wo3, bo, scale,
                                     need_weights=need_weights)
    # (N, L, E) -> (L, N, E): batch_first=False output layout.
    return jnp.transpose(out_nle, (1, 0, 2)), attn


# ----------------------------------------------------------------------------
# Pure-JAX reference (f32, correctness check)
# ----------------------------------------------------------------------------
def reference_mha(query, key, value, params, num_heads):
    L, N, E = query.shape
    S = key.shape[0]
    H = num_heads
    Dh = E // H
    scale = 1.0 / float(Dh) ** 0.5
    in_w, in_b = params["in_proj_weight"], params["in_proj_bias"]
    out_w, out_b = params["out_proj_weight"], params["out_proj_bias"]
    wq, wk, wv = in_w[:E], in_w[E:2 * E], in_w[2 * E:]
    bq, bk, bv = in_b[:E], in_b[E:2 * E], in_b[2 * E:]
    q = (query.reshape(L * N, E) @ wq.T + bq).reshape(L, N, H, Dh)
    k = (key.reshape(S * N, E) @ wk.T + bk).reshape(S, N, H, Dh)
    v = (value.reshape(S * N, E) @ wv.T + bv).reshape(S, N, H, Dh)
    s = jnp.einsum("lnhd,snhd->nhls", q * scale, k)
    p = jax.nn.softmax(s, axis=-1)                    # (N, H, L, S)
    ctx = jnp.einsum("nhls,snhd->lnhd", p, v)         # (L, N, H, Dh)
    out = (ctx.reshape(L * N, E) @ out_w.T + out_b).reshape(L, N, E)
    return out, p.mean(axis=1)                        # weights: (N, L, S)


# ----------------------------------------------------------------------------
# Main
# ----------------------------------------------------------------------------
if __name__ == "__main__":
    embed_dim = 32
    num_heads = 4
    L = 8      # target seq len
    S = 8      # source seq len
    N = 2      # batch

    root = jax.random.PRNGKey(0)
    k_q, k_k, k_v, k_wi, k_wo = jax.random.split(root, 5)

    # Deterministic parameter init (xavier-uniform-like weights, zero biases).
    bound_in = (6.0 / (3 * embed_dim + embed_dim)) ** 0.5
    bound_out = (6.0 / (2 * embed_dim)) ** 0.5
    params = {
        "in_proj_weight": jax.random.uniform(
            k_wi, (3 * embed_dim, embed_dim), jnp.float32, -bound_in, bound_in),
        "in_proj_bias": jnp.zeros((3 * embed_dim,), jnp.float32),
        "out_proj_weight": jax.random.uniform(
            k_wo, (embed_dim, embed_dim), jnp.float32, -bound_out, bound_out),
        "out_proj_bias": jnp.zeros((embed_dim,), jnp.float32),
    }

    query = jax.random.normal(k_q, (L, N, embed_dim), jnp.float32)
    key_ = jax.random.normal(k_k, (S, N, embed_dim), jnp.float32)
    value = jax.random.normal(k_v, (S, N, embed_dim), jnp.float32)

    # bf16 MXU operands (f32 accumulation) -> a few-percent-of-a-ulp-of-bf16
    # style error; tolerance sized accordingly.
    tol = dict(atol=5e-2, rtol=5e-2)

    cases = {
        "self_attn (fused QKV proj)": (query, query, query),
        "shared KV (stacked KV proj)": (query, key_, key_),
        "general (separate projs)": (query, key_, value),
    }
    for name, (q_in, k_in, v_in) in cases.items():
        out, w = multihead_attention(q_in, k_in, v_in, params, num_heads)
        jax.block_until_ready((out, w))
        ref_out, ref_w = reference_mha(q_in, k_in, v_in, params, num_heads)
        assert out.shape == (L, N, embed_dim), name
        assert w.shape == (N, L, S), name
        assert jnp.allclose(out, ref_out, **tol), name
        assert jnp.allclose(w, ref_w, **tol), name

    # need_weights=False path: skips the attention-weight output entirely.
    out_nw, w_nw = multihead_attention(query, key_, value, params, num_heads,
                                       need_weights=False)
    jax.block_until_ready(out_nw)
    ref_out, _ = reference_mha(query, key_, value, params, num_heads)
    assert w_nw is None
    assert jnp.allclose(out_nw, ref_out, **tol)

    print("KERNEL_OK")
</pallas_src>

<mosaic_0001>
module attributes {stable_mosaic.version = 11 : i64} {
  func.func @_linear_kernel(%arg0: i32, %arg1: i32, %arg2: i32, %arg3: memref<16x32xf32, #tpu.memory_space<vmem>>, %arg4: memref<32x96xbf16, #tpu.memory_space<vmem>>, %arg5: memref<1x96xf32, #tpu.memory_space<vmem>>, %arg6: memref<16x96xbf16, #tpu.memory_space<vmem>>, %arg7: memref<16x96xf32, #tpu.memory_space<vmem>>) attributes {dimension_semantics = [#tpu.dimension_semantics<parallel>, #tpu.dimension_semantics<parallel>, #tpu.dimension_semantics<arbitrary>], iteration_bounds = array<i64: 1, 1, 1>, scalar_prefetch = 0 : i64, scratch_operands = 1 : i64, tpu.core_type = #tpu.core_type<tc>, window_params = [{transform_indices = @transform_0, window_bounds = array<i64: 16, 32>}, {transform_indices = @transform_1, window_bounds = array<i64: 32, 96>}, {transform_indices = @transform_2, window_bounds = array<i64: 1, 96>}, {transform_indices = @transform_3, window_bounds = array<i64: 16, 96>}]} {
    %c0_i32 = arith.constant 0 : i32
    %0 = arith.cmpi eq, %arg2, %c0_i32 : i32
    %1 = arith.extui %0 : i1 to i32
    %c0_i32_0 = arith.constant 0 : i32
    %2 = arith.cmpi ne, %1, %c0_i32_0 : i32
    scf.if %2 {
      %cst_10 = arith.constant 0.000000e+00 : f32
      %13 = vector.broadcast %cst_10 : f32 to vector<16x96xf32>
      %c0_11 = arith.constant 0 : index
      %c0_12 = arith.constant 0 : index
      %14 = vector.load %arg7[%c0_11, %c0_12] : memref<16x96xf32, #tpu.memory_space<vmem>>, vector<16x96xf32>
      tpu.vector_store %arg7[%c0_11, %c0_12], %13 {strides = array<i32>} : memref<16x96xf32, #tpu.memory_space<vmem>>, vector<16x96xf32>,
    } else {
    }
    %c0 = arith.constant 0 : index
    %c0_1 = arith.constant 0 : index
    %3 = vector.load %arg7[%c0, %c0_1] : memref<16x96xf32, #tpu.memory_space<vmem>>, vector<16x96xf32>
    %c0_2 = arith.constant 0 : index
    %c0_3 = arith.constant 0 : index
    %4 = vector.load %arg3[%c0_2, %c0_3] : memref<16x32xf32, #tpu.memory_space<vmem>>, vector<16x32xf32>
    %5 = arith.truncf %4 : vector<16x32xf32> to vector<16x32xbf16>
    %c0_4 = arith.constant 0 : index
    %c0_5 = arith.constant 0 : index
    %6 = vector.load %arg4[%c0_4, %c0_5] : memref<32x96xbf16, #tpu.memory_space<vmem>>, vector<32x96xbf16>
    %cst = arith.constant dense<0.000000e+00> : vector<16x96xf32>
    %7 = tpu.matmul %5, %6, %cst {dimension_numbers = #tpu.dot_dimension_numbers<[1], [0], [0], [1], [0, 0, 1, 1], [], []>} : vector<16x32xbf16>, vector<32x96xbf16>, vector<16x96xf32> -> vector<16x96xf32>
    %8 = arith.addf %3, %7 : vector<16x96xf32>
    %c0_6 = arith.constant 0 : index
    %c0_7 = arith.constant 0 : index
    %9 = vector.load %arg7[%c0_6, %c0_7] : memref<16x96xf32, #tpu.memory_space<vmem>>, vector<16x96xf32>
    tpu.vector_store %arg7[%c0_6, %c0_7], %8 {strides = array<i32>} : memref<16x96xf32, #tpu.memory_space<vmem>>, vector<16x96xf32>,
    %c0_i32_8 = arith.constant 0 : i32
    %10 = arith.cmpi eq, %arg2, %c0_i32_8 : i32
    %11 = arith.extui %10 : i1 to i32
    %c0_i32_9 = arith.constant 0 : i32
    %12 = arith.cmpi ne, %11, %c0_i32_9 : i32
    scf.if %12 {
      %c0_10 = arith.constant 0 : index
      %c0_11 = arith.constant 0 : index
      %13 = vector.load %arg7[%c0_10, %c0_11] : memref<16x96xf32, #tpu.memory_space<vmem>>, vector<16x96xf32>
      %c0_12 = arith.constant 0 : index
      %c0_13 = arith.constant 0 : index
      %14 = vector.load %arg5[%c0_12, %c0_13] : memref<1x96xf32, #tpu.memory_space<vmem>>, vector<1x96xf32>
      %15 = vector.broadcast %14 : vector<1x96xf32> to vector<16x96xf32>
      %16 = arith.addf %13, %15 : vector<16x96xf32>
      %17 = arith.truncf %16 : vector<16x96xf32> to vector<16x96xbf16>
      %c0_14 = arith.constant 0 : index
      %c0_15 = arith.constant 0 : index
      %18 = vector.load %arg6[%c0_14, %c0_15] : memref<16x96xbf16, #tpu.memory_space<vmem>>, vector<16x96xbf16>
      tpu.vector_store %arg6[%c0_14, %c0_15], %17 {strides = array<i32>} : memref<16x96xbf16, #tpu.memory_space<vmem>>, vector<16x96xbf16>,
    } else {
    }
    return
  }
  func.func @transform_0(%arg0: i32, %arg1: i32, %arg2: i32) -> (i32, i32) {
    %c0_i32 = arith.constant 0 : i32
    return %arg0, %arg2 : i32, i32
  }
  func.func @transform_1(%arg0: i32, %arg1: i32, %arg2: i32) -> (i32, i32) {
    %c0_i32 = arith.constant 0 : i32
    return %arg2, %arg1 : i32, i32
  }
  func.func @transform_2(%arg0: i32, %arg1: i32, %arg2: i32) -> (i32, i32) {
    %c0_i32 = arith.constant 0 : i32
    %c0_i32_0 = arith.constant 0 : i32
    return %c0_i32, %arg1 : i32, i32
  }
  func.func @transform_3(%arg0: i32, %arg1: i32, %arg2: i32) -> (i32, i32) {
    %c0_i32 = arith.constant 0 : i32
    return %arg0, %arg1 : i32, i32
  }
}

</mosaic_0001>

<bundles_post_ra>
// kernel: tpu_custom_call.1
= control target key start
LH: loop header
LB: loop body
LE: loop exit
PB: predicated region body
PF: predicated region fallthrough
CT: control target
= control target key end

     0   :  { %8 = vsyncpa [#allocation4], 0  ;;  %s345_s0 = inlined_call_operand.hbm [shape: f32[16,32], index: 0, kind: input, shape index: {}]   ;;  %s346_s1 = inlined_call_operand.hbm [shape: bf16[32,96], index: 1, kind: input, shape index: {}]   ;;  %s347_s2 = inlined_call_operand.vmem [shape: f32[1,96], index: 2, kind: input, shape index: {}]   ;;  %s348_s3 = inlined_call_operand.hbm [shape: bf16[16,96], index: 3, kind: output, shape index: {}]  }
   0x1   :  { %9 = vsyncpa [#allocation7], 0 }
   0x2   :  { %10 = vsyncpa [#allocation5], 0  ;;  %s267_s12 = smov [#allocation3]   ;;  %s195_s16 = scalar_lea.hbm %s345_s0, 256 }
   0x3   :  { %s16_s13 = sshll.u32 %s267_s12, 4  ;;  %p196_p0 = scmp.ne.s32.totalorder %s345_s0, %s195_s16  ;;  %s17_s13 = int_to_ptr.vmem [resolvable:$true] %s16_s13 }
   0x4   :  { %p199_p1 = scmp.lt.u32.totalorder %s195_s16, %s345_s0 }
   0x6   :  { %p201_p2 = pnand %p199_p1, %p196_p0 }
   0x8   :  { %204 = shalt.err (!%p201_p2)
}
   0x9   :  { %s205_s21 = scalar_lea.vmem %s17_s13, 256  ;;  %p210_p4 = scmp.lt.s32.totalorder %s17_s13, %s17_s13 }
   0xa   :  { %p206_p3 = scmp.ne.s32.totalorder %s17_s13, %s205_s21  ;;  %p211_p5 = scmp.lt.s32.totalorder %s205_s21, %s205_s21 }
   0xc   :  { %p212_p6 = por %p211_p5, %p210_p4 }
   0xe   :  { %p213_p7 = pnand %p212_p6, %p206_p3 }
  0x10   :  { %216 = shalt.err (!%p213_p7)
}
  0x11   :  { %s268_s22 = smov 128   ;;  %s269_s23 = smov 8  }
  0x12   :  { %22 = dma.hbm_to_vmem [thread:$0]  %s345_s0, 256, %s17_s13, [#allocation4], %s268_s22, %s268_s22, %s269_s23  }
  0x13   :  { %s270_s26 = smov [#allocation6]   ;;  %s217_s30 = scalar_lea.hbm %s346_s1, 256 }
  0x14   :  { %s28_s27 = sshll.u32 %s270_s26, 4  ;;  %p218_p8 = scmp.ne.s32.totalorder %s346_s1, %s217_s30  ;;  %s29_s27 = int_to_ptr.vmem [resolvable:$true] %s28_s27 }
  0x15   :  { %p221_p9 = scmp.lt.u32.totalorder %s217_s30, %s346_s1 }
  0x17   :  { %p223_p10 = pnand %p221_p9, %p218_p8 }
  0x19   :  { %226 = shalt.err (!%p223_p10)
}
  0x1a   :  { %s227_s8 = scalar_lea.vmem %s29_s27, 256  ;;  %p232_p12 = scmp.lt.s32.totalorder %s29_s27, %s29_s27 }
  0x1b   :  { %p228_p11 = scmp.ne.s32.totalorder %s29_s27, %s227_s8  ;;  %p233_p13 = scmp.lt.s32.totalorder %s227_s8, %s227_s8 }
  0x1d   :  { %p234_p0 = por %p233_p13, %p232_p12 }
  0x1f   :  { %p235_p1 = pnand %p234_p0, %p228_p11 }
  0x21   :  { %238 = shalt.err (!%p235_p1)
}
  0x22   :  { %s271_s0 = smov 64   ;;  %s272_s9 = smov 4  }
  0x23   :  { %34 = dma.hbm_to_vmem [thread:$0]  %s346_s1, 256, %s29_s27, [#allocation7], %s271_s0, %s271_s0, %s272_s9  }
  0x24   :  { %261 = dma.done.wait [#allocation4], 256  }
  0x25   :  { %262 = vsyncadd [#allocation4], 4294967040 }
  0x26   :  { %263 = dma.done.wait [#allocation7], 256  }
  0x27   :  { %264 = vsyncadd [#allocation7], 4294967040  ;;  %vm48_vm0 = vcmask 785408   ;;  %v273_v0 = vmov 0.0   ;;  %vm274_vm1 = vmmov 0   ;;  %v193_v1 = vld [vmem:[#allocation6] sm:$0xff]  }
  0x28   :  { %49 = vst.msk [vmem:[#allocation2] sm:$0xff] %vm48_vm0, %v273_v0  ;;  %50 = vst.msk [vmem:[#allocation2 + $0x8] sm:$0xff] %vm48_vm0, %v273_v0  ;;  %176 = vmatprep.subr.bf16.mxu0 %v273_v0  ;;  %180 = vmatprep.mubr.msk.bf16.mxu0 %vm274_vm1, %v273_v0  ;;  %v194_v2 = vld [vmem:[#allocation6 + $0x8] sm:$0xff]   ;;  %v53_v3 = vld [vmem:[#allocation3] sm:$0xff]  ;;  %vm72_vm2 = vcmask 261120   ;;  %vm144_vm3 = vcmask 781312  }
  0x29   :  { %177 = vmatpush3.bf16.msra.mxu0 %v193_v1  ;;  %v54_v4 = vld [vmem:[#allocation3 + $0x8] sm:$0xff]  ;;  %v168_v14 = vld [vmem:[%s347_s2] ss:$0 sm:$0xff]  ;;  %s275_s13 = smov [#allocation8]  }
  0x2a   :  { %178 = vmatprep.subr.bf16.mxu0 %v273_v0  ;;  %v55_v5 = vpack.c.bf16 %v54_v4, %v53_v3  ;;  %s152_s14 = sshll.u32 %s275_s13, 4  ;;  %s153_s14 = int_to_ptr.vmem [resolvable:$true] %s152_s14 }
  0x2b   :  { %s239_s15 = scalar_lea.vmem %s153_s14, 128  ;;  %p244_p3 = scmp.lt.s32.totalorder %s153_s14, %s153_s14 }
  0x2c   :  { %p240_p2 = scmp.ne.s32.totalorder %s153_s14, %s239_s15  ;;  %p245_p4 = scmp.lt.s32.totalorder %s239_s15, %s239_s15 }
  0x2d   :  { %179 = vmatpush3.bf16.msra.mxu0 %v194_v2 }
  0x2e   :  { %p246_p5 = por %p245_p4, %p244_p3 }
  0x2f   :  { %v51_v6 = vld [vmem:[#allocation2] sm:$0xff]  ;;  %v52_v8 = vld [vmem:[#allocation2 + $0x8] sm:$0xff] }
  0x30   :  { %181 = vmatmul.mubr.msk.bf16.vlgmr.msra.gmra.mrb[0].mxu0 %vm72_vm2, %v55_v5  ;;  %p247_p6 = pnand %p246_p5, %p240_p2 }
 0x103   :  { %v110_v7 = vpop.f32.mrb[0].mxu0 }
 0x104   :  { %v117_v9 = vadd.f32 %v110_v7, %v51_v6  ;;  %v182_v10 = vpop.f32.mrb[1].mxu0 }
 0x105   :  { %v113_v11 = vpop.f32.mrb[2].mxu0 }
 0x106   :  { %120 = vst.msk [vmem:[#allocation2] sm:$0xff] %vm48_vm0, %v117_v9  ;;  %v118_v12 = vadd.f32 %v113_v11, %v52_v8  ;;  %v183_v13 = vpop.f32.mrb[3].mxu0 }
 0x108   :  { %121 = vst.msk [vmem:[#allocation2 + $0x8] sm:$0xff] %vm48_vm0, %v118_v12 }
 0x10d   :  { %v125_v15 = vld [vmem:[#allocation2] sm:$0xff] }
 0x10e   :  { %v134_v16 = vadd.f32 %v168_v14, %v125_v15 }
 0x10f   :  { %v126_v17 = vld [vmem:[#allocation2 + $0x8] sm:$0xff] }
 0x110   :  { %v135_v18 = vadd.f32 %v168_v14, %v126_v17  ;;  %v171_v19 = vpack.c.bf16 %v134_v16, %v134_v16 }
 0x112   :  { %v172_v20 = vpack.c.bf16 %v135_v18, %v135_v18  ;;  %145 = vst.msk [vmem:[#allocation8] sm:$0xf] %vm144_vm3, %v171_v19 }
 0x114   :  { %146 = vst.msk [vmem:[#allocation8 + $0x4] sm:$0xf] %vm144_vm3, %v172_v20 }
 0x115   :  { %250 = shalt.err (!%p247_p6)
}
 0x116   :  { %s251_s17 = scalar_lea.hbm %s348_s3, 128 }
 0x117   :  { %p252_p7 = scmp.ne.s32.totalorder %s348_s3, %s251_s17  ;;  %p255_p8 = scmp.lt.u32.totalorder %s251_s17, %s348_s3 }
 0x119   :  { %p257_p9 = pnand %p255_p8, %p252_p7 }
 0x11b   :  { %260 = shalt.err (!%p257_p9)
}
 0x11c   :  { %158 = dma.vmem_to_hbm [thread:$0]  %s153_s14, 128, %s348_s3, [#allocation5], %s271_s0, %s271_s0, %s272_s9  }
 0x11d   :  { %265 = dma.done.wait [#allocation5], 128  }
 0x11e   :  { %266 = vsyncadd [#allocation5], 4294967168 }
 0x11f   :  { %162 = vsyncpa [#allocation4], 1 }
 0x120   :  { %163 = vsyncpa [#allocation7], 1 }
 0x121   :  { %164 = vsyncpa [#allocation5], 1 }

</bundles_post_ra>
